<compile_context>
chip_gen: v5e
topology: v5e:2x2
jax: 0.10.0
libtpu: 0.0.40
codegen_flags: <defaults>
</compile_context>

<pallas_src>
import functools

import jax
import jax.numpy as jnp
from jax.experimental import pallas as pl
from jax.experimental.pallas import tpu as pltpu

LANE = 128


def _round_up(x, m):
    return ((x + m - 1) // m) * m


# --------------------------------------------------------------------------- kernel
def gin_fused_kernel(adj_ref, x0_ref, w1_ref, b1_ref, w2_ref, b2_ref,
                     gamma_ref, beta_ref, p_ref,
                     xout_ref, pool_ref):
    """All GIN layers in one kernel; grid axis = layer (sequential, carries state).

    Per layer:  x <- BN(ReLU(MLP((A + I) @ x)));   pool[layer] = P @ x
    adj / x0 / P use a constant block index -> fetched into VMEM once for the whole
    grid; the evolving node features live in the resident xout output buffer
    (constant block index), which doubles as the layer-to-layer carry.
    """
    layer = pl.program_id(0)

    @pl.when(layer == 0)
    def _():
        xout_ref[...] = x0_ref[...]

    x = xout_ref[...]

    # GINConv aggregation, eps=0 self term folded into (A + I).
    # bf16 operands, f32 accumulation on the MXU.
    agg = jnp.dot(adj_ref[...], x.astype(jnp.bfloat16),
                  preferred_element_type=jnp.float32)

    # mlp = Linear -> ReLU -> Linear (weights zero-padded to the lane width; padded
    # columns remain exactly zero through every op below).
    h1 = jnp.dot(agg, w1_ref[...], preferred_element_type=jnp.float32) + b1_ref[...]
    h1 = jnp.maximum(h1, 0.0)
    h2 = jnp.dot(h1, w2_ref[...], preferred_element_type=jnp.float32) + b2_ref[...]

    # outer ReLU
    xa = jnp.maximum(h2, 0.0)

    # BatchNorm1d over nodes (training-mode batch statistics, biased variance), f32,
    # folded into a single per-column scale/shift.
    mean = jnp.mean(xa, axis=0, keepdims=True)
    var = jnp.mean(xa * xa, axis=0, keepdims=True) - mean * mean
    scale = jax.lax.rsqrt(var + 1e-5) * gamma_ref[...]
    shift = beta_ref[...] - mean * scale
    xbn = xa * scale + shift

    xout_ref[...] = xbn                       # carry; final layer's value is written back
    # global_add_pool == P @ x with P[g, n] = 1 iff node n belongs to graph g.
    pool_ref[...] = jnp.dot(p_ref[...], xbn, preferred_element_type=jnp.float32)


# --------------------------------------------------------------------------- wrapper
@functools.partial(jax.jit, static_argnames=("hidden_dim",))
def gin_forward(x_pad, adj_aug, pool_mat, stacked, hidden_dim):
    """x_pad: [N, W] f32 (zero-padded features), adj_aug: [N, N] bf16 (A + I),
    pool_mat: [G, N] f32, stacked: dict of per-layer padded params [L, ...]."""
    n_nodes, w_pad = x_pad.shape
    n_graphs = pool_mat.shape[0]
    n_layers = stacked["w1"].shape[0]

    def full(shape):                      # whole-array block, constant index
        return pl.BlockSpec(shape, lambda l: tuple(0 for _ in shape))

    def per_layer(shape):                 # one layer slice per grid step (leading dim squeezed)
        return pl.BlockSpec((None,) + shape, lambda l: (l,) + tuple(0 for _ in shape))

    xout, pooled = pl.pallas_call(
        gin_fused_kernel,
        out_shape=(
            jax.ShapeDtypeStruct((n_nodes, w_pad), jnp.float32),
            jax.ShapeDtypeStruct((n_layers, n_graphs, w_pad), jnp.float32),
        ),
        grid=(n_layers,),
        in_specs=[
            full((n_nodes, n_nodes)),      # adj_aug (bf16), fetched once
            full((n_nodes, w_pad)),        # x0 (f32), fetched once
            per_layer((w_pad, w_pad)),     # w1
            per_layer((1, w_pad)),         # b1
            per_layer((w_pad, w_pad)),     # w2
            per_layer((1, w_pad)),         # b2
            per_layer((1, w_pad)),         # gamma
            per_layer((1, w_pad)),         # beta
            full((n_graphs, n_nodes)),     # pool matrix, fetched once
        ],
        out_specs=(
            full((n_nodes, w_pad)),        # x after last layer (resident; doubles as carry)
            per_layer((n_graphs, w_pad)),  # per-layer pooled reps (lane-dense)
        ),
        compiler_params=pltpu.CompilerParams(
            dimension_semantics=("arbitrary",)),   # layer axis carries state
    )(adj_aug, x_pad, stacked["w1"], stacked["b1"], stacked["w2"], stacked["b2"],
      stacked["gamma"], stacked["beta"], pool_mat)

    # Un-pad and assemble the PyTorch outputs.
    xs_pooled = pooled[:, :, :hidden_dim]                          # [L, G, H]
    global_rep = jnp.transpose(xs_pooled, (1, 0, 2)).reshape(n_graphs, -1)
    x_last = xout[:, :hidden_dim]
    return global_rep, x_last


# --------------------------------------------------------------------------- params / glue
def xavier_uniform(key, fan_in, fan_out):
    bound = (6.0 / (fan_in + fan_out)) ** 0.5
    # stored as [in, out] so the kernel computes x @ W (== PyTorch x @ W.T)
    return jax.random.uniform(key, (fan_in, fan_out), jnp.float32, -bound, bound)


def init_gin_params(key, feat_dim, hidden_dim, n_layers):
    params = []
    for i in range(n_layers):
        start_dim = hidden_dim if i else feat_dim
        key, k1, k2 = jax.random.split(key, 3)
        w1 = xavier_uniform(k1, start_dim, hidden_dim)
        b1 = jnp.zeros((hidden_dim,), jnp.float32)
        w2 = xavier_uniform(k2, hidden_dim, hidden_dim)
        b2 = jnp.zeros((hidden_dim,), jnp.float32)
        gamma = jnp.ones((hidden_dim,), jnp.float32)   # BatchNorm1d weight
        beta = jnp.zeros((hidden_dim,), jnp.float32)   # BatchNorm1d bias
        params.append((w1, b1, w2, b2, gamma, beta))
    return params


def stack_and_pad_params(params, feat_dim, hidden_dim):
    """Zero-pad every layer's params to one lane-aligned width W and stack along a
    leading layer axis.  Exact: padded rows/cols keep all padded feature columns 0."""
    w = _round_up(max(feat_dim, hidden_dim), LANE)
    w1s, b1s, w2s, b2s, gs, bs = [], [], [], [], [], []
    for (w1, b1, w2, b2, gamma, beta) in params:
        w1s.append(jnp.zeros((w, w), jnp.float32).at[:w1.shape[0], :w1.shape[1]].set(w1))
        w2s.append(jnp.zeros((w, w), jnp.float32).at[:w2.shape[0], :w2.shape[1]].set(w2))
        b1s.append(jnp.zeros((1, w), jnp.float32).at[0, :b1.shape[0]].set(b1))
        b2s.append(jnp.zeros((1, w), jnp.float32).at[0, :b2.shape[0]].set(b2))
        gs.append(jnp.ones((1, w), jnp.float32).at[0, :gamma.shape[0]].set(gamma))
        bs.append(jnp.zeros((1, w), jnp.float32).at[0, :beta.shape[0]].set(beta))
    stacked = {
        "w1": jnp.stack(w1s), "b1": jnp.stack(b1s),
        "w2": jnp.stack(w2s), "b2": jnp.stack(b2s),
        "gamma": jnp.stack(gs), "beta": jnp.stack(bs),
    }
    return stacked, w


def edge_index_to_adj_plus_i(edge_index, n_nodes):
    # A[t, s] = #edges s -> t (scatter-add semantics of GINConv); +I folds the
    # (1 + eps) * x self term with eps = 0.  Small integer counts are exact in bf16.
    src, dst = edge_index[0], edge_index[1]
    adj = jnp.zeros((n_nodes, n_nodes), jnp.float32).at[dst, src].add(1.0)
    adj = adj + jnp.eye(n_nodes, dtype=jnp.float32)
    return adj.astype(jnp.bfloat16)


def batch_to_pool_matrix(batch, n_graphs):
    # P[g, n] = 1 iff node n is in graph g  -> P @ x == global_add_pool(x, batch)
    return jax.nn.one_hot(batch, n_graphs, axis=0, dtype=jnp.float32)


def pad_features(x, w):
    n, f = x.shape
    return jnp.zeros((n, w), jnp.float32).at[:, :f].set(x)


# --------------------------------------------------------------------------- demo
if __name__ == "__main__":
    feat_dim, hidden_dim, n_layers = 16, 32, 3
    n_nodes, n_graphs, n_edges = 64, 4, 256

    key = jax.random.PRNGKey(0)
    k_x, k_e, k_p = jax.random.split(key, 3)

    # node features
    x = jax.random.normal(k_x, (n_nodes, feat_dim), jnp.float32)
    # random directed edges [2, E]
    edge_index = jax.random.randint(k_e, (2, n_edges), 0, n_nodes, jnp.int32)
    # contiguous batch assignment: 16 nodes per graph
    batch = jnp.repeat(jnp.arange(n_graphs, dtype=jnp.int32), n_nodes // n_graphs)

    adj_aug = edge_index_to_adj_plus_i(edge_index, n_nodes)        # glue (plain JAX)
    pool_mat = batch_to_pool_matrix(batch, n_graphs)               # glue (plain JAX)
    params = init_gin_params(k_p, feat_dim, hidden_dim, n_layers)
    stacked, w_pad = stack_and_pad_params(params, feat_dim, hidden_dim)
    x_pad = pad_features(x, w_pad)

    global_rep, x_last = gin_forward(x_pad, adj_aug, pool_mat, stacked,
                                     hidden_dim=hidden_dim)
    jax.block_until_ready((global_rep, x_last))

    assert global_rep.shape == (n_graphs, n_layers * hidden_dim)
    assert x_last.shape == (n_nodes, hidden_dim)
    assert bool(jnp.all(jnp.isfinite(global_rep))) and bool(jnp.all(jnp.isfinite(x_last)))
    print("KERNEL_OK")
</pallas_src>

<mosaic_0001>
module attributes {stable_mosaic.version = 11 : i64} {
  func.func @gin_fused_kernel(%arg0: i32, %arg1: memref<64x64xbf16, #tpu.memory_space<vmem>>, %arg2: memref<64x128xf32, #tpu.memory_space<vmem>>, %arg3: memref<1x128x128xf32, #tpu.memory_space<vmem>>, %arg4: memref<1x1x128xf32, #tpu.memory_space<vmem>>, %arg5: memref<1x128x128xf32, #tpu.memory_space<vmem>>, %arg6: memref<1x1x128xf32, #tpu.memory_space<vmem>>, %arg7: memref<1x1x128xf32, #tpu.memory_space<vmem>>, %arg8: memref<1x1x128xf32, #tpu.memory_space<vmem>>, %arg9: memref<4x64xf32, #tpu.memory_space<vmem>>, %arg10: memref<64x128xf32, #tpu.memory_space<vmem>>, %arg11: memref<1x4x128xf32, #tpu.memory_space<vmem>>) attributes {dimension_semantics = [#tpu.dimension_semantics<arbitrary>], iteration_bounds = array<i64: 3>, scalar_prefetch = 0 : i64, scratch_operands = 0 : i64, tpu.core_type = #tpu.core_type<tc>, window_params = [{pipeline_mode = #tpu.pipeline_mode<synchronous>, transform_indices = @transform_0, window_bounds = array<i64: 64, 64>}, {pipeline_mode = #tpu.pipeline_mode<synchronous>, transform_indices = @transform_1, window_bounds = array<i64: 64, 128>}, {transform_indices = @transform_2, window_bounds = array<i64: 1, 128, 128>}, {transform_indices = @transform_3, window_bounds = array<i64: 1, 1, 128>}, {transform_indices = @transform_4, window_bounds = array<i64: 1, 128, 128>}, {transform_indices = @transform_5, window_bounds = array<i64: 1, 1, 128>}, {transform_indices = @transform_6, window_bounds = array<i64: 1, 1, 128>}, {transform_indices = @transform_7, window_bounds = array<i64: 1, 1, 128>}, {pipeline_mode = #tpu.pipeline_mode<synchronous>, transform_indices = @transform_8, window_bounds = array<i64: 4, 64>}, {pipeline_mode = #tpu.pipeline_mode<synchronous>, transform_indices = @transform_9, window_bounds = array<i64: 64, 128>}, {transform_indices = @transform_10, window_bounds = array<i64: 1, 4, 128>}]} {
    %c0_i32 = arith.constant 0 : i32
    %0 = arith.cmpi eq, %arg0, %c0_i32 : i32
    %1 = arith.extui %0 : i1 to i32
    %c0_i32_0 = arith.constant 0 : i32
    %2 = arith.cmpi ne, %1, %c0_i32_0 : i32
    scf.if %2 {
      %c0_39 = arith.constant 0 : index
      %c0_40 = arith.constant 0 : index
      %56 = vector.load %arg2[%c0_39, %c0_40] : memref<64x128xf32, #tpu.memory_space<vmem>>, vector<64x128xf32>
      %c0_41 = arith.constant 0 : index
      %c0_42 = arith.constant 0 : index
      %57 = vector.load %arg10[%c0_41, %c0_42] : memref<64x128xf32, #tpu.memory_space<vmem>>, vector<64x128xf32>
      tpu.vector_store %arg10[%c0_41, %c0_42], %56 {strides = array<i32>} : memref<64x128xf32, #tpu.memory_space<vmem>>, vector<64x128xf32>,
    } else {
    }
    %c0 = arith.constant 0 : index
    %c0_1 = arith.constant 0 : index
    %3 = vector.load %arg10[%c0, %c0_1] : memref<64x128xf32, #tpu.memory_space<vmem>>, vector<64x128xf32>
    %c0_2 = arith.constant 0 : index
    %c0_3 = arith.constant 0 : index
    %4 = vector.load %arg1[%c0_2, %c0_3] : memref<64x64xbf16, #tpu.memory_space<vmem>>, vector<64x64xbf16>
    %5 = arith.truncf %3 : vector<64x128xf32> to vector<64x128xbf16>
    %cst = arith.constant dense<0.000000e+00> : vector<64x128xf32>
    %6 = tpu.matmul %4, %5, %cst {dimension_numbers = #tpu.dot_dimension_numbers<[1], [0], [0], [1], [0, 0, 1, 1], [], []>} : vector<64x64xbf16>, vector<64x128xbf16>, vector<64x128xf32> -> vector<64x128xf32>
    %c0_4 = arith.constant 0 : index
    %c0_5 = arith.constant 0 : index
    %c0_6 = arith.constant 0 : index
    %7 = vector.load %arg3[%c0_4, %c0_5, %c0_6] : memref<1x128x128xf32, #tpu.memory_space<vmem>>, vector<1x128x128xf32>
    %8 = vector.shape_cast %7 : vector<1x128x128xf32> to vector<128x128xf32>
    %cst_7 = arith.constant dense<0.000000e+00> : vector<64x128xf32>
    %9 = tpu.matmul %6, %8, %cst_7 {dimension_numbers = #tpu.dot_dimension_numbers<[1], [0], [0], [1], [0, 0, 1, 1], [], []>} : vector<64x128xf32>, vector<128x128xf32>, vector<64x128xf32> -> vector<64x128xf32>
    %c0_8 = arith.constant 0 : index
    %c0_9 = arith.constant 0 : index
    %c0_10 = arith.constant 0 : index
    %10 = vector.load %arg4[%c0_8, %c0_9, %c0_10] : memref<1x1x128xf32, #tpu.memory_space<vmem>>, vector<1x1x128xf32>
    %11 = vector.shape_cast %10 : vector<1x1x128xf32> to vector<1x128xf32>
    %12 = vector.broadcast %11 : vector<1x128xf32> to vector<64x128xf32>
    %13 = arith.addf %9, %12 : vector<64x128xf32>
    %cst_11 = arith.constant 0.000000e+00 : f32
    %14 = vector.broadcast %cst_11 : f32 to vector<64x128xf32>
    %15 = arith.maximumf %13, %14 : vector<64x128xf32>
    %c0_12 = arith.constant 0 : index
    %c0_13 = arith.constant 0 : index
    %c0_14 = arith.constant 0 : index
    %16 = vector.load %arg5[%c0_12, %c0_13, %c0_14] : memref<1x128x128xf32, #tpu.memory_space<vmem>>, vector<1x128x128xf32>
    %17 = vector.shape_cast %16 : vector<1x128x128xf32> to vector<128x128xf32>
    %cst_15 = arith.constant dense<0.000000e+00> : vector<64x128xf32>
    %18 = tpu.matmul %15, %17, %cst_15 {dimension_numbers = #tpu.dot_dimension_numbers<[1], [0], [0], [1], [0, 0, 1, 1], [], []>} : vector<64x128xf32>, vector<128x128xf32>, vector<64x128xf32> -> vector<64x128xf32>
    %c0_16 = arith.constant 0 : index
    %c0_17 = arith.constant 0 : index
    %c0_18 = arith.constant 0 : index
    %19 = vector.load %arg6[%c0_16, %c0_17, %c0_18] : memref<1x1x128xf32, #tpu.memory_space<vmem>>, vector<1x1x128xf32>
    %20 = vector.shape_cast %19 : vector<1x1x128xf32> to vector<1x128xf32>
    %21 = vector.broadcast %20 : vector<1x128xf32> to vector<64x128xf32>
    %22 = arith.addf %18, %21 : vector<64x128xf32>
    %cst_19 = arith.constant 0.000000e+00 : f32
    %23 = vector.broadcast %cst_19 : f32 to vector<64x128xf32>
    %24 = arith.maximumf %22, %23 : vector<64x128xf32>
    %cst_20 = arith.constant dense<0.000000e+00> : vector<128xf32>
    %25 = vector.multi_reduction <add>, %24, %cst_20 [0] : vector<64x128xf32> to vector<128xf32>
    %26 = vector.shape_cast %25 : vector<128xf32> to vector<1x128xf32>
    %cst_21 = arith.constant 6.400000e+01 : f32
    %27 = vector.broadcast %cst_21 : f32 to vector<1x128xf32>
    %28 = arith.divf %26, %27 : vector<1x128xf32>
    %29 = arith.mulf %24, %24 : vector<64x128xf32>
    %cst_22 = arith.constant dense<0.000000e+00> : vector<128xf32>
    %30 = vector.multi_reduction <add>, %29, %cst_22 [0] : vector<64x128xf32> to vector<128xf32>
    %31 = vector.shape_cast %30 : vector<128xf32> to vector<1x128xf32>
    %cst_23 = arith.constant 6.400000e+01 : f32
    %32 = vector.broadcast %cst_23 : f32 to vector<1x128xf32>
    %33 = arith.divf %31, %32 : vector<1x128xf32>
    %34 = arith.mulf %28, %28 : vector<1x128xf32>
    %35 = arith.subf %33, %34 : vector<1x128xf32>
    %cst_24 = arith.constant 9.99999974E-6 : f32
    %36 = vector.broadcast %cst_24 : f32 to vector<1x128xf32>
    %37 = arith.addf %35, %36 : vector<1x128xf32>
    %38 = math.rsqrt %37 : vector<1x128xf32>
    %c0_25 = arith.constant 0 : index
    %c0_26 = arith.constant 0 : index
    %c0_27 = arith.constant 0 : index
    %39 = vector.load %arg7[%c0_25, %c0_26, %c0_27] : memref<1x1x128xf32, #tpu.memory_space<vmem>>, vector<1x1x128xf32>
    %40 = vector.shape_cast %39 : vector<1x1x128xf32> to vector<1x128xf32>
    %41 = arith.mulf %38, %40 : vector<1x128xf32>
    %c0_28 = arith.constant 0 : index
    %c0_29 = arith.constant 0 : index
    %c0_30 = arith.constant 0 : index
    %42 = vector.load %arg8[%c0_28, %c0_29, %c0_30] : memref<1x1x128xf32, #tpu.memory_space<vmem>>, vector<1x1x128xf32>
    %43 = vector.shape_cast %42 : vector<1x1x128xf32> to vector<1x128xf32>
    %44 = arith.mulf %28, %41 : vector<1x128xf32>
    %45 = arith.subf %43, %44 : vector<1x128xf32>
    %46 = vector.broadcast %41 : vector<1x128xf32> to vector<64x128xf32>
    %47 = arith.mulf %24, %46 : vector<64x128xf32>
    %48 = vector.broadcast %45 : vector<1x128xf32> to vector<64x128xf32>
    %49 = arith.addf %47, %48 : vector<64x128xf32>
    %c0_31 = arith.constant 0 : index
    %c0_32 = arith.constant 0 : index
    %50 = vector.load %arg10[%c0_31, %c0_32] : memref<64x128xf32, #tpu.memory_space<vmem>>, vector<64x128xf32>
    tpu.vector_store %arg10[%c0_31, %c0_32], %49 {strides = array<i32>} : memref<64x128xf32, #tpu.memory_space<vmem>>, vector<64x128xf32>,
    %c0_33 = arith.constant 0 : index
    %c0_34 = arith.constant 0 : index
    %51 = vector.load %arg9[%c0_33, %c0_34] : memref<4x64xf32, #tpu.memory_space<vmem>>, vector<4x64xf32>
    %cst_35 = arith.constant dense<0.000000e+00> : vector<4x128xf32>
    %52 = tpu.matmul %51, %49, %cst_35 {dimension_numbers = #tpu.dot_dimension_numbers<[1], [0], [0], [1], [0, 0, 1, 1], [], []>} : vector<4x64xf32>, vector<64x128xf32>, vector<4x128xf32> -> vector<4x128xf32>
    %c0_36 = arith.constant 0 : index
    %c0_37 = arith.constant 0 : index
    %c0_38 = arith.constant 0 : index
    %53 = vector.load %arg11[%c0_36, %c0_37, %c0_38] : memref<1x4x128xf32, #tpu.memory_space<vmem>>, vector<1x4x128xf32>
    %54 = vector.shape_cast %53 : vector<1x4x128xf32> to vector<4x128xf32>
    %55 = vector.shape_cast %52 : vector<4x128xf32> to vector<1x4x128xf32>
    tpu.vector_store %arg11[%c0_36, %c0_37, %c0_38], %55 {strides = array<i32>} : memref<1x4x128xf32, #tpu.memory_space<vmem>>, vector<1x4x128xf32>,
    return
  }
  func.func @transform_0(%arg0: i32) -> (i32, i32) {
    %c0_i32 = arith.constant 0 : i32
    %c0_i32_0 = arith.constant 0 : i32
    %c0_i32_1 = arith.constant 0 : i32
    return %c0_i32, %c0_i32_0 : i32, i32
  }
  func.func @transform_1(%arg0: i32) -> (i32, i32) {
    %c0_i32 = arith.constant 0 : i32
    %c0_i32_0 = arith.constant 0 : i32
    %c0_i32_1 = arith.constant 0 : i32
    return %c0_i32, %c0_i32_0 : i32, i32
  }
  func.func @transform_2(%arg0: i32) -> (i32, i32, i32) {
    %c0_i32 = arith.constant 0 : i32
    %c0_i32_0 = arith.constant 0 : i32
    %c0_i32_1 = arith.constant 0 : i32
    return %arg0, %c0_i32, %c0_i32_0 : i32, i32, i32
  }
  func.func @transform_3(%arg0: i32) -> (i32, i32, i32) {
    %c0_i32 = arith.constant 0 : i32
    %c0_i32_0 = arith.constant 0 : i32
    %c0_i32_1 = arith.constant 0 : i32
    return %arg0, %c0_i32, %c0_i32_0 : i32, i32, i32
  }
  func.func @transform_4(%arg0: i32) -> (i32, i32, i32) {
    %c0_i32 = arith.constant 0 : i32
    %c0_i32_0 = arith.constant 0 : i32
    %c0_i32_1 = arith.constant 0 : i32
    return %arg0, %c0_i32, %c0_i32_0 : i32, i32, i32
  }
  func.func @transform_5(%arg0: i32) -> (i32, i32, i32) {
    %c0_i32 = arith.constant 0 : i32
    %c0_i32_0 = arith.constant 0 : i32
    %c0_i32_1 = arith.constant 0 : i32
    return %arg0, %c0_i32, %c0_i32_0 : i32, i32, i32
  }
  func.func @transform_6(%arg0: i32) -> (i32, i32, i32) {
    %c0_i32 = arith.constant 0 : i32
    %c0_i32_0 = arith.constant 0 : i32
    %c0_i32_1 = arith.constant 0 : i32
    return %arg0, %c0_i32, %c0_i32_0 : i32, i32, i32
  }
  func.func @transform_7(%arg0: i32) -> (i32, i32, i32) {
    %c0_i32 = arith.constant 0 : i32
    %c0_i32_0 = arith.constant 0 : i32
    %c0_i32_1 = arith.constant 0 : i32
    return %arg0, %c0_i32, %c0_i32_0 : i32, i32, i32
  }
  func.func @transform_8(%arg0: i32) -> (i32, i32) {
    %c0_i32 = arith.constant 0 : i32
    %c0_i32_0 = arith.constant 0 : i32
    %c0_i32_1 = arith.constant 0 : i32
    return %c0_i32, %c0_i32_0 : i32, i32
  }
  func.func @transform_9(%arg0: i32) -> (i32, i32) {
    %c0_i32 = arith.constant 0 : i32
    %c0_i32_0 = arith.constant 0 : i32
    %c0_i32_1 = arith.constant 0 : i32
    return %c0_i32, %c0_i32_0 : i32, i32
  }
  func.func @transform_10(%arg0: i32) -> (i32, i32, i32) {
    %c0_i32 = arith.constant 0 : i32
    %c0_i32_0 = arith.constant 0 : i32
    %c0_i32_1 = arith.constant 0 : i32
    return %arg0, %c0_i32, %c0_i32_0 : i32, i32, i32
  }
}

</mosaic_0001>

<bundles_post_ra>
// kernel: gin_forward.1
= control target key start
LH: loop header
LB: loop body
LE: loop exit
PB: predicated region body
PF: predicated region fallthrough
CT: control target
= control target key end

     0   :  { %s2017_s0 = inlined_call_operand.hbm [shape: bf16[64,64], index: 0, kind: input, shape index: {}]   ;;  %s2018_s1 = inlined_call_operand.hbm [shape: f32[64,128], index: 1, kind: input, shape index: {}]   ;;  %s2019_s2 = inlined_call_operand.hbm [shape: f32[3,128,128], index: 2, kind: input, shape index: {}]   ;;  %s2020_s3 = inlined_call_operand.vmem [shape: f32[3,1,128], index: 3, kind: input, shape index: {}]   ;;  %s2021_s4 = inlined_call_operand.hbm [shape: f32[3,128,128], index: 4, kind: input, shape index: {}]   ;;  %s2022_s5 = inlined_call_operand.hbm [shape: f32[3,1,128], index: 5, kind: input, shape index: {}]   ;;  %s2023_s6 = inlined_call_operand.hbm [shape: f32[3,1,128], index: 6, kind: input, shape index: {}]   ;;  %s2024_s7 = inlined_call_operand.hbm [shape: f32[3,1,128], index: 7, kind: input, shape index: {}]   ;;  %s2025_s8 = inlined_call_operand.hbm [shape: f32[4,64], index: 8, kind: input, shape index: {}]   ;;  %s2026_s9 = inlined_call_operand.vmem [shape: f32[64,128], index: 9, kind: output, shape index: {0}]   ;;  %s2027_s10 = inlined_call_operand.vmem [shape: f32[3,4,128], index: 10, kind: output, shape index: {1}]  }
   0x1   :  { %2034 = sst [smem:[#allocation19_spill]] %s2017_s0 }
   0x2   :  { %2035 = sst [smem:[#allocation20_spill]] %s2018_s1 }
   0x3   :  { %2036 = sst [smem:[#allocation21_spill]] %s2020_s3 }
   0x4   :  { %2037 = sst [smem:[#allocation22_spill]] %s2026_s9 }
   0x5   :  { %2038 = sst [smem:[#allocation23_spill]] %s2027_s10 }
   0x6   :  { %16 = vsyncpa [#allocation3], 0 }
   0x7   :  { %17 = vsyncpa [#allocation5], 0  ;;  %s1620_s13 = smov 0   ;;  %s1622_s14 = smov 0  }
   0x8   :  { %s1624_s15 = smov 0   ;;  %s1626_s16 = smov 0  }
   0x9 LB: > { %2039 = sst [smem:[#allocation16_spill]] %s1551_s15  ;;  %s1639_s17 = sadd.s32 4294967295, %s1555_s16   ;;  %s1555_s16 = sphi %s1626_s16, %s2056_s16   ;;  %s1551_s15 = sphi %s1624_s15, %s2058_s15   ;;  %s1547_s14 = sphi %s1622_s14, %s2060_s14   ;;  %s1543_s13 = sphi %s1620_s13, %s2059_s13  }
   0xa   : > { %s1642_s18 = sadd.s32 1, %s1555_s16   ;;  %s72_s20 = sadd.s32 1, %s1551_s15 }
   0xb   : > { %2040 = sst [smem:[#allocation17_spill]] %s1642_s18  ;;  %s69_s19 = ssub.s32 %s1555_s16, %s1642_s18 }
   0xc   : > { %p70_p0 = scmp.eq.s32.totalorder %s69_s19, 0  ;;  %p79_p1 = scmp.ne.s32.totalorder %s1551_s15, %s1547_s14 }
   0xd   : > { %p80_p2 = scmp.eq.s32.totalorder %s1555_s16, 0  ;;  %p85_p3 = scmp.ne.s32.totalorder %s1547_s14, %s1543_s13 }
   0xe   : > { %s1652_s21 = scalar_select %p70_p0, %s1551_s15, %s72_s20  }
   0xf   : > { %p1654_p4 = por %p80_p2, %p79_p1  ;;  %p86_p5 = scmp.eq.s32.totalorder %s1639_s17, 0 }
  0x10   : > { %2041 = sst [smem:[#allocation18_spill]] %s1652_s21  ;;  %p1104_p6 = scmp.ge.s32.totalorder %s1555_s16, 1 }
  0x11   : > { %p294_p7 = scmp.lt.s32.totalorder %s1555_s16, 4  ;;  %p1663_p8 = por %p86_p5, %p85_p3 }
  0x12   : > { %p1105_p9 = scmp.ne.s32.totalorder %s1639_s17, 0  ;;  %s2045_s0 = sld [smem:[#allocation19_spill]] }
  0x13   : > { %p1668_p10 = pnand %p1104_p6, %p294_p7  ;;  %s1557_s28 = smov [#allocation2]  }
  0x14   : > { %s307_s29 = sshll.u32 %s1557_s28, 4  ;;  %s1558_s11 = smov 64   ;;  %s308_s29 = int_to_ptr.vmem [resolvable:$true] %s307_s29 }
  0x15   : > { %p1190_p11 = pneg %p1668_p10  ;;  %s1559_s12 = smov 4  }
  0x16   : > { %p1219_p13 = scmp.lt.s32.totalorder %s1555_s16, 3  ;;  %s347_s13 = sand.u32 1, %s1555_s16  }
  0x17   : > { %p1679_p12 = pnand %p1190_p11, %p86_p5  ;;  %s1688_s19 = sand.u32 1, %s1551_s15  }
  0x18   : > { %s305_s27 = sshll.u32 %s2045_s0, 4  ;;  %s1109_s20 = sshll.u32 %s1688_s19, 7  ;;  %s306_s27 = int_to_ptr.hbm [resolvable:$true] %s305_s27 }
  0x19   : > { %1193 = dma.hbm_to_vmem [thread:$0]  (!%p1679_p12), %s306_s27, 512, %s308_s29, [#allocation3], %s1558_s11, %s1558_s11, %s1559_s12  }
  0x1a   : > { %s1146_s25 = sshll.u32 %s1555_s16, 7  ;;  %s351_s18 = scalar_lea.vmem [#allocation6], %s1109_s20 }
  0x1b   : > { %s356_s0 = scalar_lea.hbm %s2019_s2, %s1146_s25  ;;  %s359_s9 = sshll.u32 %s351_s18, 4  ;;  %s360_s9 = int_to_ptr.vmem [resolvable:$true] %s359_s9 }
  0x1c   : > { %s357_s21 = sshll.u32 %s356_s0, 4  ;;  %p1697_p0 = pnand %p1219_p13, %p1654_p4  ;;  %s358_s21 = int_to_ptr.hbm [resolvable:$true] %s357_s21 }
  0x1d   : > { %s384_s11 = scalar_lea.hbm %s2021_s4, %s1146_s25  ;;  %s379_s12 = scalar_lea.vmem [#allocation7], %s1109_s20 }
  0x1e   : > { %s387_s15 = sshll.u32 %s379_s12, 4  ;;  %s385_s3 = sshll.u32 %s384_s11, 4  ;;  %s386_s3 = int_to_ptr.hbm [resolvable:$true] %s385_s3  ;;  %s388_s15 = int_to_ptr.vmem [resolvable:$true] %s387_s15 }
  0x1f   : > { %s1704_s26 = scalar_lea.sflag [#allocation3], %s347_s13  ;;  %s1299_s0 = sshra.s32 %s358_s21, 4  ;;  %s1300_s0 = int_to_ptr.hbm [resolvable:$true] %s1299_s0 }
  0x20   : > { %s1301_s18 = scalar_lea.hbm %s1300_s0, 128  ;;  %p1708_p2 = pneg %p1697_p0 }
  0x21   : > { %p1302_p1 = scmp.ne.s32.totalorder %s1300_s0, %s1301_s18  ;;  %s1306_s20 = scalar_lea.hbm %s2019_s2, 384 }
  0x22   : > { %p1307_p6 = scmp.lt.s32.totalorder %s1300_s0, %s2019_s2  ;;  %p1308_p7 = scmp.lt.s32.totalorder %s1306_s20, %s1301_s18 }
  0x23   : > { %p1304_p3 = pnand %p1708_p2, %p1302_p1 }
  0x24   : > { %p1309_p11 = por %p1308_p7, %p1307_p6 }
  0x25   : > { %p1305_p4 = pneg %p1304_p3 }
  0x27   : > { %p1310_p13 = pnand %p1309_p11, %p1305_p4 }
  0x29   : > { %1313 = shalt.err (!%p1310_p13)
}
  0x2a   : > { %s2033_s29 = smov 128   ;;  %s1561_s11 = smov 8  }
  0x2b   : > { %1203 = dma.hbm_to_vmem [thread:$0]  (!%p1697_p0), %s358_s21, 2048, %s360_s9, %s1704_s26, %s2033_s29, %s2033_s29, %s1561_s11  }
  0x2c   : > { %s1329_s12 = sshra.s32 %s386_s3, 4  ;;  %s1336_s25 = scalar_lea.hbm %s2021_s4, 384  ;;  %s1330_s12 = int_to_ptr.hbm [resolvable:$true] %s1329_s12 }
  0x2d   : > { %s1331_s28 = scalar_lea.hbm %s1330_s12, 128  ;;  %p1337_p6 = scmp.lt.s32.totalorder %s1330_s12, %s2021_s4 }
  0x2e   : > { %p1332_p1 = scmp.ne.s32.totalorder %s1330_s12, %s1331_s28  ;;  %p1338_p7 = scmp.lt.s32.totalorder %s1336_s25, %s1331_s28 }
  0x30   : > { %p1334_p3 = pnand %p1332_p1, %p1708_p2  ;;  %p1339_p11 = por %p1338_p7, %p1337_p6 }
  0x32   : > { %p1335_p4 = pneg %p1334_p3 }
  0x34   : > { %p1340_p13 = pnand %p1339_p11, %p1335_p4 }
  0x36   : > { %1343 = shalt.err (!%p1340_p13)
}
  0x37   : > { %1206 = dma.hbm_to_vmem [thread:$0]  (!%p1697_p0), %s386_s3, 2048, %s388_s15, %s1704_s26, %s2033_s29, %s2033_s29, %s1561_s11  }
  0x38   : > { %s403_s13 = scalar_lea.hbm %s2022_s5, %s1555_s16  ;;  %s400_s12 = scalar_lea.vmem [#allocation8], %s1688_s19 }
  0x39   : > { %s405_s0 = sshll.u32 %s403_s13, 4  ;;  %s407_s28 = sshll.u32 %s400_s12, 4  ;;  %s406_s0 = int_to_ptr.hbm [resolvable:$true] %s405_s0  ;;  %s408_s28 = int_to_ptr.vmem [resolvable:$true] %s407_s28 }
  0x3a   : > { %s1359_s18 = sshra.s32 %s406_s0, 4  ;;  %s1366_s3 = scalar_lea.hbm %s2022_s5, 3  ;;  %s1360_s18 = int_to_ptr.hbm [resolvable:$true] %s1359_s18 }
  0x3b   : > { %s1361_s25 = scalar_lea.hbm %s1360_s18, 1  ;;  %p1367_p6 = scmp.lt.s32.totalorder %s1360_s18, %s2022_s5 }
  0x3c   : > { %p1362_p1 = scmp.ne.s32.totalorder %s1360_s18, %s1361_s25  ;;  %p1368_p7 = scmp.lt.s32.totalorder %s1366_s3, %s1361_s25 }
  0x3e   : > { %p1364_p3 = pnand %p1362_p1, %p1708_p2  ;;  %p1369_p11 = por %p1368_p7, %p1367_p6 }
  0x40   : > { %p1365_p4 = pneg %p1364_p3 }
  0x42   : > { %p1370_p13 = pnand %p1369_p11, %p1365_p4 }
  0x44   : > { %1373 = shalt.err (!%p1370_p13)
}
  0x45   : > { %1209 = dma.hbm_to_vmem [thread:$0]  (!%p1697_p0), %s406_s0, 16, %s408_s28, %s1704_s26  }
  0x46   : > { %s2049_s1 = sld [smem:[#allocation20_spill]]  ;;  %s1562_s12 = smov [#allocation4]  }
  0x47   : > { %s321_s29 = sshll.u32 %s1562_s12, 4  ;;  %s2050_s18 = smov 128   ;;  %s322_s29 = int_to_ptr.vmem [resolvable:$true] %s321_s29 }
  0x48   : > { %s420_s27 = scalar_lea.hbm %s2023_s6, %s1555_s16  ;;  %s417_s3 = scalar_lea.vmem [#allocation9], %s1688_s19 }
  0x49   : > { %s424_s0 = sshll.u32 %s417_s3, 4  ;;  %s422_s28 = sshll.u32 %s420_s27, 4  ;;  %s425_s0 = int_to_ptr.vmem [resolvable:$true] %s424_s0  ;;  %s423_s28 = int_to_ptr.hbm [resolvable:$true] %s422_s28 }
  0x4a   : > { %s334_s21 = sshll.u32 %s2025_s8, 4  ;;  %s1419_s12 = sshra.s32 %s423_s28, 4  ;;  %s1420_s12 = int_to_ptr.hbm [resolvable:$true] %s1419_s12  ;;  %s335_s21 = int_to_ptr.hbm [resolvable:$true] %s334_s21 }
  0x4b   : > { %p1427_p6 = scmp.lt.s32.totalorder %s1420_s12, %s2023_s6 }
  0x4c   : > { %s319_s13 = sshll.u32 %s2049_s1, 4  ;;  %s1421_s1 = scalar_lea.hbm %s1420_s12, 1  ;;  %s320_s13 = int_to_ptr.hbm [resolvable:$true] %s319_s13 }
  0x4d   : > { %1196 = dma.hbm_to_vmem [thread:$0]  (!%p1679_p12), %s320_s13, 1024, %s322_s29, [#allocation5], %s2050_s18, %s2050_s18, %s1561_s11  }
  0x4e   : > { %p1422_p1 = scmp.ne.s32.totalorder %s1420_s12, %s1421_s1  ;;  %s1426_s29 = scalar_lea.hbm %s2023_s6, 3 }
  0x4f   : > { %p1428_p7 = scmp.lt.s32.totalorder %s1426_s29, %s1421_s1 }
  0x50   : > { %p1424_p3 = pnand %p1422_p1, %p1708_p2 }
  0x51   : > { %p1429_p11 = por %p1428_p7, %p1427_p6 }
  0x52   : > { %p1425_p4 = pneg %p1424_p3 }
  0x54   : > { %p1430_p13 = pnand %p1429_p11, %p1425_p4 }
  0x56   : > { %1433 = shalt.err (!%p1430_p13)
}
  0x57   : > { %1212 = dma.hbm_to_vmem [thread:$0]  (!%p1697_p0), %s423_s28, 16, %s425_s0, %s1704_s26  }
  0x58   : > { %s1563_s20 = smov [#allocation11]   ;;  %s437_s9 = scalar_lea.hbm %s2024_s7, %s1555_s16 }
  0x59   : > { %s336_s27 = sshll.u32 %s1563_s20, 4  ;;  %s439_s1 = sshll.u32 %s437_s9, 4  ;;  %s337_s27 = int_to_ptr.vmem [resolvable:$true] %s336_s27  ;;  %s440_s1 = int_to_ptr.hbm [resolvable:$true] %s439_s1 }
  0x5a   : > { %1199 = dma.hbm_to_vmem [thread:$0]  (!%p1679_p12), %s335_s21, 64, %s337_s27, [#allocation5]  }
  0x5b   : > { %s434_s12 = scalar_lea.vmem [#allocation10], %s1688_s19  ;;  %s1479_s13 = sshra.s32 %s440_s1, 4  ;;  %s1480_s13 = int_to_ptr.hbm [resolvable:$true] %s1479_s13 }
  0x5c   : > { %s441_s11 = sshll.u32 %s434_s12, 4  ;;  %s1481_s29 = scalar_lea.hbm %s1480_s13, 1  ;;  %s442_s11 = int_to_ptr.vmem [resolvable:$true] %s441_s11 }
  0x5d   : > { %p1482_p1 = scmp.ne.s32.totalorder %s1480_s13, %s1481_s29  ;;  %s1486_s18 = scalar_lea.hbm %s2024_s7, 3 }
  0x5e   : > { %p1487_p12 = scmp.lt.s32.totalorder %s1480_s13, %s2024_s7  ;;  %p1488_p6 = scmp.lt.s32.totalorder %s1486_s18, %s1481_s29 }
  0x5f   : > { %p1484_p3 = pnand %p1482_p1, %p1708_p2 }
  0x60   : > { %p1489_p7 = por %p1488_p6, %p1487_p12 }
  0x61   : > { %p1485_p4 = pneg %p1484_p3 }
  0x63   : > { %p1490_p11 = pnand %p1489_p7, %p1485_p4 }
  0x65   : > { %1493 = shalt.err (!%p1490_p11)
}
  0x66   : > { %1215 = dma.hbm_to_vmem [thread:$0]  (!%p1697_p0), %s440_s1, 16, %s442_s11, %s1704_s26  }
  0x67   : > { %450 = sbr.rel (%p1668_p10) target bundleno = 811 (0x32b), region = 56 }
  0x6c   : > { %1526 = dma.done.wait (%p86_p5), [#allocation3], 512  }
  0x6d   : > { %1528 = vsyncadd (%p86_p5), [#allocation3], 4294966784 }
  0x6e   : > { %1530 = dma.done.wait (%p86_p5), [#allocation5], 1024  }
  0x6f   : > { %1532 = vsyncadd (%p86_p5), [#allocation5], 4294966272  ;;  %s462_s10 = sand.u32 1, %s1639_s17   ;;  %s1813_s30 = sand.u32 1, %s1547_s14  }
  0x70   : > { %s1118_s24 = sshll.u32 %s1813_s30, 7  ;;  %s463_s19 = scalar_lea.sflag [#allocation3], %s462_s10 }
  0x71   : > { %s1816_s26 = scalar_lea.vmem [#allocation6], %s1118_s24 }
  0x72   : > { %1534 = dma.done.wait (%p1663_p8), %s463_s19, 4144  }
  0x73   : > { %1536 = vsyncadd (%p1663_p8), %s463_s19, 4294963152  ;;  %s1822_s22 = scalar_lea.vmem [#allocation7], %s1118_s24  ;;  %s485_s21 = scalar_lea.vmem [#allocation8], %s1813_s30 }
  0x74   : > { %s494_s20 = scalar_lea.vmem [#allocation9], %s1813_s30  ;;  %s503_s27 = scalar_lea.vmem [#allocation10], %s1813_s30 }
  0x75   : > { %1538 = dma.done.wait (%p86_p5), [#allocation5], 64  }
  0x76   : > { %1540 = vsyncadd (%p86_p5), [#allocation5], 4294967232  ;;  %p565_p10 = scmp.lt.s32.totalorder %s1639_s17, 2  ;;  %s2051_s9 = sld [smem:[#allocation21_spill]] }
  0x77   : > { %s2052_s29 = sld [smem:[#allocation23_spill]] }
  0x78   : > { %s1833_s3 = scalar_select %p565_p10, %s1639_s17, 2 }
  0x79   : > { %576 = sbr.rel (%p1105_p9) target bundleno = 135 (0x87), region = 92  ;;  %s2053_s25 = sld [smem:[#allocation22_spill]] (!%p1105_p9) }
  0x7a   : > { %s1121_s12 = sshll.u32 %s1833_s3, 2 }
  0x7c   : > { %s567_s1 = scalar_lea.vmem %s2051_s9, %s1833_s3 }
  0x7d   : > { %s1843_s0 = scalar_lea.vmem %s2052_s29, %s1121_s12 }
  0x7e   : > { %v577_v0 = vld [vmem:[#allocation4] sm:$0xff]  ;;  %v578_v1 = vld [vmem:[#allocation4 + $0x8] sm:$0xff]  ;;  %v579_v2 = vld [vmem:[#allocation4 + $0x10] sm:$0xff] }
  0x7f   : > { %585 = vst [vmem:[%s2053_s25] sm:$0xff] %v577_v0  ;;  %v580_v3 = vld [vmem:[#allocation4 + $0x18] sm:$0xff]  ;;  %v581_v4 = vld [vmem:[#allocation4 + $0x20] sm:$0xff]  ;;  %v582_v5 = vld [vmem:[#allocation4 + $0x28] sm:$0xff] }
  0x80   : > { %586 = vst [vmem:[%s2053_s25 + $0x8] sm:$0xff] %v578_v1  ;;  %v583_v6 = vld [vmem:[#allocation4 + $0x30] sm:$0xff]  ;;  %v584_v7 = vld [vmem:[#allocation4 + $0x38] sm:$0xff] }
  0x81   : > { %587 = vst [vmem:[%s2053_s25 + $0x10] sm:$0xff] %v579_v2 }
  0x82   : > { %588 = vst [vmem:[%s2053_s25 + $0x18] sm:$0xff] %v580_v3 }
  0x83   : > { %589 = vst [vmem:[%s2053_s25 + $0x20] sm:$0xff] %v581_v4 }
  0x84   : > { %590 = vst [vmem:[%s2053_s25 + $0x28] sm:$0xff] %v582_v5 }
  0x85   : > { %591 = vst [vmem:[%s2053_s25 + $0x30] sm:$0xff] %v583_v6 }
  0x86   : > { %592 = vst [vmem:[%s2053_s25 + $0x38] sm:$0xff] %v584_v7 }
  0x87 PF: > { %s2054_s24 = sld [smem:[#allocation22_spill]]  ;;  %v1148_v20 = vld [vmem:[#allocation2] sm:$0xff]  ;;  %vm633_vm0 = vcmask 523264   ;;  %v1149_v21 = vld [vmem:[#allocation2 + $0x8] sm:$0xff]  ;;  %v690_v22 = vld [vmem:[%s1816_s26 + $0x78] sm:$0xff] }
  0x88   : > { %v689_v23 = vld [vmem:[%s1816_s26 + $0x70] sm:$0xff]  ;;  %695 = vmatpush.msra.mxu1 %v690_v22  ;;  %1152 = vmatpush.msra.mxu3 %v690_v22  ;;  %v688_v24 = vld [vmem:[%s1816_s26 + $0x68] sm:$0xff]  ;;  %v687_v25 = vld [vmem:[%s1816_s26 + $0x60] sm:$0xff] }
  0x89   : > { %v686_v26 = vld [vmem:[%s1816_s26 + $0x58] sm:$0xff]  ;;  %v685_v27 = vld [vmem:[%s1816_s26 + $0x50] sm:$0xff]  ;;  %v684_v28 = vld [vmem:[%s1816_s26 + $0x48] sm:$0xff] }
  0x8a   : > { %696 = vmatpush.msra.mxu1 %v689_v23  ;;  %1153 = vmatpush.msra.mxu3 %v689_v23  ;;  %v1150_v29 = vld [vmem:[#allocation2 + $0x10] sm:$0xff]  ;;  %v683_v30 = vld [vmem:[%s1816_s26 + $0x40] sm:$0xff]  ;;  %v682_v31 = vld [vmem:[%s1816_s26 + $0x38] sm:$0xff] }
  0x8b   : > { %v681_v32 = vld [vmem:[%s1816_s26 + $0x30] sm:$0xff]  ;;  %v680_v33 = vld [vmem:[%s1816_s26 + $0x28] sm:$0xff]  ;;  %v679_v34 = vld [vmem:[%s1816_s26 + $0x20] sm:$0xff] }
  0x8c   : > { %697 = vmatpush.msra.mxu1 %v688_v24  ;;  %1154 = vmatpush.msra.mxu3 %v688_v24  ;;  %v678_v35 = vld [vmem:[%s1816_s26 + $0x18] sm:$0xff]  ;;  %v677_v36 = vld [vmem:[%s1816_s26 + $0x10] sm:$0xff]  ;;  %v676_v37 = vld [vmem:[%s1816_s26 + $0x8] sm:$0xff] }
  0x8d   : > { %v599_v8 = vld [vmem:[%s2054_s24 + $0x30] sm:$0xff]  ;;  %v600_v9 = vld [vmem:[%s2054_s24 + $0x38] sm:$0xff]  ;;  %v597_v10 = vld [vmem:[%s2054_s24 + $0x20] sm:$0xff] }
  0x8e   : > { %v612_v11 = vpack.c.bf16 %v600_v9, %v599_v8  ;;  %v598_v12 = vld [vmem:[%s2054_s24 + $0x28] sm:$0xff]  ;;  %v595_v14 = vld [vmem:[%s2054_s24 + $0x10] sm:$0xff]  ;;  %v596_v15 = vld [vmem:[%s2054_s24 + $0x18] sm:$0xff]  ;;  %698 = vmatpush.msra.mxu1 %v687_v25  ;;  %1155 = vmatpush.msra.mxu3 %v687_v25 }
  0x8f   : > { %v611_v13 = vpack.c.bf16 %v598_v12, %v597_v10  ;;  %v610_v16 = vpack.c.bf16 %v596_v15, %v595_v14  ;;  %v593_v17 = vld [vmem:[%s2054_s24] sm:$0xff]  ;;  %v594_v18 = vld [vmem:[%s2054_s24 + $0x8] sm:$0xff]  ;;  %v1151_v38 = vld [vmem:[#allocation2 + $0x18] sm:$0xff] }
  0x90   : > { %650 = vmatpush.bf16.msra.mxu0 %v612_v11  ;;  %v609_v19 = vpack.c.bf16 %v594_v18, %v593_v17  ;;  %699 = vmatpush.msra.mxu1 %v686_v26  ;;  %v675_v39 = vld [vmem:[%s1816_s26] sm:$0xff]  ;;  %v759_v44 = vld [vmem:[%s1822_s22 + $0x78] sm:$0xff]  ;;  %v758_v45 = vld [vmem:[%s1822_s22 + $0x70] sm:$0xff] }
  0x91   : > { %1156 = vmatpush.msra.mxu3 %v686_v26  ;;  %764 = vmatpush.msra.mxu2 %v759_v44  ;;  %v757_v46 = vld [vmem:[%s1822_s22 + $0x68] sm:$0xff]  ;;  %v756_v47 = vld [vmem:[%s1822_s22 + $0x60] sm:$0xff]  ;;  %v755_v48 = vld [vmem:[%s1822_s22 + $0x58] sm:$0xff] }
  0x92   : > { %700 = vmatpush.msra.mxu1 %v685_v27  ;;  %v754_v50 = vld [vmem:[%s1822_s22 + $0x50] sm:$0xff]  ;;  %v753_v51 = vld [vmem:[%s1822_s22 + $0x48] sm:$0xff]  ;;  %v752_v52 = vld [vmem:[%s1822_s22 + $0x40] sm:$0xff] }
  0x93   : > { %1157 = vmatpush.msra.mxu3 %v685_v27  ;;  %765 = vmatpush.msra.mxu2 %v758_v45  ;;  %v751_v53 = vld [vmem:[%s1822_s22 + $0x38] sm:$0xff]  ;;  %v750_v55 = vld [vmem:[%s1822_s22 + $0x30] sm:$0xff]  ;;  %v749_v56 = vld [vmem:[%s1822_s22 + $0x28] sm:$0xff] }
  0x94   : > { %651 = vmatpush.bf16.msra.mxu0 %v611_v13  ;;  %701 = vmatpush.msra.mxu1 %v684_v28  ;;  %v748_v57 = vld [vmem:[%s1822_s22 + $0x20] sm:$0xff]  ;;  %v747_v58 = vld [vmem:[%s1822_s22 + $0x18] sm:$0xff]  ;;  %v746_v61 = vld [vmem:[%s1822_s22 + $0x10] sm:$0xff] }
  0x95   : > { %1158 = vmatpush.msra.mxu3 %v684_v28  ;;  %766 = vmatpush.msra.mxu2 %v757_v46  ;;  %v745_v62 = vld [vmem:[%s1822_s22 + $0x8] sm:$0xff]  ;;  %v744_v63 = vld [vmem:[%s1822_s22] sm:$0xff] }
  0x96   : > { %702 = vmatpush.msra.mxu1 %v683_v30  ;;  %v1263_v0 = vld [vmem:[%s567_s1] ss:$0 sm:$0xff] }
  0x97   : > { %1159 = vmatpush.msra.mxu3 %v683_v30  ;;  %767 = vmatpush.msra.mxu2 %v756_v47  ;;  %v1264_v30 = vld [vmem:[%s485_s21] ss:$0 sm:$0xff] }
  0x98   : > { %652 = vmatpush.bf16.msra.mxu0 %v610_v16  ;;  %703 = vmatpush.msra.mxu1 %v682_v31 }
  0x99   : > { %1160 = vmatpush.msra.mxu3 %v682_v31  ;;  %768 = vmatpush.msra.mxu2 %v755_v48 }
  0x9a   : > { %704 = vmatpush.msra.mxu1 %v681_v32 }
  0x9b   : > { %1161 = vmatpush.msra.mxu3 %v681_v32  ;;  %769 = vmatpush.msra.mxu2 %v754_v50 }
  0x9c   : > { %653 = vmatpush.bf16.msra.mxu0 %v609_v19  ;;  %705 = vmatpush.msra.mxu1 %v680_v33 }
  0x9d   : > { %1162 = vmatpush.msra.mxu3 %v680_v33  ;;  %770 = vmatpush.msra.mxu2 %v753_v51 }
  0x9e   : > { %706 = vmatpush.msra.mxu1 %v679_v34 }
  0x9f   : > { %1139 = vmatmul.msk.bf16.vlgmr.msra.gmra.mxu0 %vm633_vm0, %v1148_v20  ;;  %1163 = vmatpush.msra.mxu3 %v679_v34 }
  0xa0   : > { %707 = vmatpush.msra.mxu1 %v678_v35  ;;  %771 = vmatpush.msra.mxu2 %v752_v52 }
  0xa1   : > { %1164 = vmatpush.msra.mxu3 %v678_v35 }
  0xa2   : > { %708 = vmatpush.msra.mxu1 %v677_v36  ;;  %772 = vmatpush.msra.mxu2 %v751_v53 }
  0xa3   : > { %1165 = vmatpush.msra.mxu3 %v677_v36 }
  0xa4   : > { %709 = vmatpush.msra.mxu1 %v676_v37  ;;  %773 = vmatpush.msra.mxu2 %v750_v55 }
  0xa5   : > { %1166 = vmatpush.msra.mxu3 %v676_v37 }
  0xa6   : > { %710 = vmatpush.msra.mxu1 %v675_v39  ;;  %774 = vmatpush.msra.mxu2 %v749_v56 }
  0xa7   : > { %1167 = vmatpush.msra.mxu3 %v675_v39 }
  0xa8   : > { %775 = vmatpush.msra.mxu2 %v748_v57 }
  0xaa   : > { %776 = vmatpush.msra.mxu2 %v747_v58 }
  0xac   : > { %777 = vmatpush.msra.mxu2 %v746_v61 }
  0xae   : > { %778 = vmatpush.msra.mxu2 %v745_v62 }
  0xaf   : > { %1140 = vmatmul.msk.bf16.gmra.mxu0 %vm633_vm0, %v1149_v21 }
  0xb0   : > { %779 = vmatpush.msra.mxu2 %v744_v63 }
  0xbf   : > { %1141 = vmatmul.msk.bf16.gmra.mxu0 %vm633_vm0, %v1150_v29 }
  0xcf   : > { %1142 = vmatmul.msk.bf16.gmra.mxu0 %vm633_vm0, %v1151_v38 }
 0x11c   : > { %v655_v40 = vpop.f32.mrf.mxu0 }
 0x11d   : > { %711 = vmatmul.f32.vlgmr.msra.gmra.mxu1 %v655_v40 }
 0x124   : > { %v657_v41 = vpop.f32.mrf.mxu0 }
 0x125   : > { %714 = vmatmul.f32.gmra.mxu1 %v657_v41 }
 0x12c   : > { %v660_v42 = vpop.f32.mrf.mxu0 }
 0x12d   : > { %717 = vmatmul.f32.gmra.mxu1 %v660_v42 }
 0x134   : > { %v662_v43 = vpop.f32.mrf.mxu0 }
 0x135   : > { %720 = vmatmul.f32.gmra.mxu1 %v662_v43  ;;  %v1564_v43 = vmov 64.0  }
 0x136   : > { %1265 = vrcp.f32 %v1564_v43 }
 0x13c   : > { %v665_v49 = vpop.f32.mrf.mxu0 }
 0x13d   : > { %723 = vmatmul.f32.gmra.mxu1 %v665_v49 }
 0x144   : > { %v667_v54 = vpop.f32.mrf.mxu0 }
 0x145   : > { %726 = vmatmul.f32.gmra.mxu1 %v667_v54  ;;  %v1266_v54 = vpop.eup %1265 }
 0x146   : > { %v827_v63 = vmul.f32 64.0, %v1266_v54  ;;  %vm831_vm1 = vweird.f32 %v1266_v54 }
 0x14c   : > { %v670_v59 = vpop.f32.mrf.mxu0 }
 0x14d   : > { %729 = vmatmul.f32.vlgmr.msra.gmra.mxu3 %v670_v59 }
 0x154   : > { %v672_v60 = vpop.f32.mrf.mxu0 }
 0x155   : > { %732 = vmatmul.f32.gmra.mxu3 %v672_v60 }
 0x19a   : > { %v712_v1 = vpop.f32.mrf.mxu1 }
 0x19b   : > { %v713_v2 = vadd.f32 %v1263_v0, %v712_v1 }
 0x19d   : > { %v736_v3 = vmax.f32 %v713_v2, 0.0 }
 0x19f   : > { %780 = vmatmul.f32.vlgmr.msra.gmra.mxu2 %v736_v3 }
 0x1a2   : > { %v715_v4 = vpop.f32.mrf.mxu1 }
 0x1a3   : > { %v716_v5 = vadd.f32 %v1263_v0, %v715_v4 }
 0x1a5   : > { %v737_v6 = vmax.f32 %v716_v5, 0.0 }
 0x1a7   : > { %783 = vmatmul.f32.gmra.mxu2 %v737_v6 }
 0x1aa   : > { %v718_v7 = vpop.f32.mrf.mxu1 }
 0x1ab   : > { %v719_v8 = vadd.f32 %v1263_v0, %v718_v7  ;;  %v828_v7 = vsub.f32 1.0, %v827_v63 }
 0x1ad   : > { %v738_v9 = vmax.f32 %v719_v8, 0.0 }
 0x1af   : > { %786 = vmatmul.f32.gmra.mxu2 %v738_v9 }
 0x1b2   : > { %v721_v10 = vpop.f32.mrf.mxu1 }
 0x1b3   : > { %v722_v11 = vadd.f32 %v1263_v0, %v721_v10 }
 0x1b5   : > { %v739_v12 = vmax.f32 %v722_v11, 0.0 }
 0x1b7   : > { %789 = vmatmul.f32.gmra.mxu2 %v739_v12 }
 0x1ba   : > { %v724_v13 = vpop.f32.mrf.mxu1 }
 0x1bb   : > { %v725_v14 = vadd.f32 %v1263_v0, %v724_v13  ;;  %v829_v13 = vmul.f32 %v1266_v54, %v828_v7 }
 0x1bd   : > { %v740_v15 = vmax.f32 %v725_v14, 0.0 }
 0x1bf   : > { %792 = vmatmul.f32.gmra.mxu2 %v740_v15 }
 0x1c2   : > { %v727_v16 = vpop.f32.mrf.mxu1 }
 0x1c3   : > { %v728_v17 = vadd.f32 %v1263_v0, %v727_v16 }
 0x1c5   : > { %v741_v18 = vmax.f32 %v728_v17, 0.0 }
 0x1c7   : > { %795 = vmatmul.f32.gmra.mxu2 %v741_v18  ;;  %v830_v18 = vadd.f32 %v1266_v54, %v829_v13 }
 0x1d0   : > { %v730_v19 = vpop.f32.mrf.mxu3 }
 0x1d1   : > { %v731_v20 = vadd.f32 %v1263_v0, %v730_v19 }
 0x1d3   : > { %v742_v21 = vmax.f32 %v731_v20, 0.0 }
 0x1d5   : > { %798 = vmatmul.f32.gmra.mxu2 %v742_v21 }
 0x1d8   : > { %v733_v22 = vpop.f32.mrf.mxu3 }
 0x1d9   : > { %v734_v23 = vadd.f32 %v1263_v0, %v733_v22 }
 0x1db   : > { %v743_v24 = vmax.f32 %v734_v23, 0.0  ;;  %v832_v23 = vsel %vm831_vm1, %v1266_v54, %v830_v18 }
 0x1dd   : > { %801 = vmatmul.f32.gmra.mxu2 %v743_v24 }
 0x222   : > { %v781_v25 = vpop.f32.mrf.mxu2 }
 0x223   : > { %v782_v32 = vadd.f32 %v1264_v30, %v781_v25 }
 0x225   : > { %v1940_v37 = vmax.f32 %v782_v32, 0.0 }
 0x227   : > { %v834_v44 = vmul.f32 %v1940_v37, %v1940_v37 }
 0x22a   : > { %v784_v26 = vpop.f32.mrf.mxu2 }
 0x22b   : > { %v785_v31 = vadd.f32 %v1264_v30, %v784_v26 }
 0x22d   : > { %v1938_v35 = vmax.f32 %v785_v31, 0.0 }
 0x22f   : > { %v835_v40 = vmul.f32 %v1938_v35, %v1938_v35  ;;  %v813_v46 = vadd.f32 %v1938_v35, %v1940_v37 }
 0x231   : > { %v842_v50 = vadd.f32 %v835_v40, %v834_v44 }
 0x232   : > { %v787_v27 = vpop.f32.mrf.mxu2 }
 0x233   : > { %v788_v34 = vadd.f32 %v1264_v30, %v787_v27 }
 0x235   : > { %v1942_v38 = vmax.f32 %v788_v34, 0.0 }
 0x237   : > { %v836_v47 = vmul.f32 %v1942_v38, %v1942_v38  ;;  %v814_v51 = vadd.f32 %v813_v46, %v1942_v38 }
 0x239   : > { %v843_v55 = vadd.f32 %v842_v50, %v836_v47 }
 0x23a   : > { %v790_v28 = vpop.f32.mrf.mxu2 }
 0x23b   : > { %v791_v36 = vadd.f32 %v1264_v30, %v790_v28 }
 0x23d   : > { %v1946_v41 = vmax.f32 %v791_v36, 0.0 }
 0x23f   : > { %v837_v52 = vmul.f32 %v1946_v41, %v1946_v41  ;;  %v815_v56 = vadd.f32 %v814_v51, %v1946_v41 }
 0x241   : > { %v844_v59 = vadd.f32 %v843_v55, %v837_v52 }
 0x242   : > { %v793_v29 = vpop.f32.mrf.mxu2 }
 0x243   : > { %v794_v39 = vadd.f32 %v1264_v30, %v793_v29 }
 0x245   : > { %v1954_v48 = vmax.f32 %v794_v39, 0.0 }
 0x247   : > { %v838_v57 = vmul.f32 %v1954_v48, %v1954_v48  ;;  %v816_v60 = vadd.f32 %v815_v56, %v1954_v48 }
 0x249   : > { %v845_v0 = vadd.f32 %v844_v59, %v838_v57 }
 0x24a   : > { %v796_v33 = vpop.f32.mrf.mxu2 }
 0x24b   : > { %v797_v42 = vadd.f32 %v1264_v30, %v796_v33 }
 0x24d   : > { %v1959_v53 = vmax.f32 %v797_v42, 0.0  ;;  %v869_v42 = vld [vmem:[%s494_s20] sm:$0x1] }
 0x24f   : > { %v839_v61 = vmul.f32 %v1959_v53, %v1959_v53  ;;  %v817_v1 = vadd.f32 %v816_v60, %v1959_v53 }
 0x251   : > { %v846_v4 = vadd.f32 %v845_v0, %v839_v61 }
 0x258   : > { %v799_v45 = vpop.f32.mrf.mxu2 }
 0x259   : > { %v800_v49 = vadd.f32 %v1264_v30, %v799_v45  ;;  %v871_v45 = vld [vmem:[%s503_s27] sm:$0x1] }
 0x25b   : > { %v811_v58 = vmax.f32 %v800_v49, 0.0 }
 0x25d   : > { %v840_v2 = vmul.f32 %v811_v58, %v811_v58  ;;  %v818_v5 = vadd.f32 %v817_v1, %v811_v58 }
 0x25f   : > { %v847_v8 = vadd.f32 %v846_v4, %v840_v2 }
 0x260   : > { %v802_v62 = vpop.f32.mrf.mxu2 }
 0x261   : > { %v803_v3 = vadd.f32 %v1264_v30, %v802_v62 }
 0x263   : > { %v812_v6 = vmax.f32 %v803_v3, 0.0 }
 0x265   : > { %v819_v9 = vadd.f32 %v818_v5, %v812_v6  ;;  %v841_v10 = vmul.f32 %v812_v6, %v812_v6 }
 0x267   : > { %v820_v11 = vrot.slane %v819_v9, 4  ;;  %v848_v12 = vadd.f32 %v847_v8, %v841_v10 }
 0x269   : > { %v821_v14 = vadd.f32 %v820_v11, %v819_v9  ;;  %v849_v15 = vrot.slane %v848_v12, 4 }
 0x26b   : > { %v822_v16 = vrot.slane %v821_v14, 2  ;;  %v850_v17 = vadd.f32 %v849_v15, %v848_v12 }
 0x26d   : > { %v823_v19 = vadd.f32 %v822_v16, %v821_v14  ;;  %v851_v20 = vrot.slane %v850_v17, 2 }
 0x26f   : > { %v824_v21 = vrot.slane %v823_v19, 1  ;;  %v852_v22 = vadd.f32 %v851_v20, %v850_v17 }
 0x271   : > { %v825_v24 = vadd.f32 %v824_v21, %v823_v19  ;;  %v853_v25 = vrot.slane %v852_v22, 1 }
 0x273   : > { %v833_v26 = vmul.f32 %v832_v23, %v825_v24  ;;  %v854_v27 = vadd.f32 %v853_v25, %v852_v22 }
 0x275   : > { %v855_v28 = vmul.f32 %v854_v27, %v832_v23  ;;  %v856_v29 = vmul.f32 %v833_v26, %v833_v26 }
 0x277   : > { %v857_v30 = vsub.f32 %v855_v28, %v856_v29 }
 0x279   : > { %v858_v31 = vadd.f32 1e-05, %v857_v30 }
 0x27b   : > { %1267 = vrsqrt.f32 %v858_v31  ;;  %vm865_vm3 = vweird.f32 %v858_v31 }
 0x281   : > { %v1268_v32 = vpop.eup %1267 }
 0x282   : > { %v860_v33 = vmul.f32 %v1268_v32, %v858_v31  ;;  %vm866_vm2 = vweird.f32 %v1268_v32 }
 0x283   : > { %vm867_vm4 = vmor %vm865_vm3, %vm866_vm2 }
 0x284   : > { %v861_v34 = vmul.f32 %v1268_v32, %v860_v33 }
 0x286   : > { %v862_v36 = vmul.f32 0.5, %v861_v34 }
 0x288   : > { %v863_v39 = vsub.f32 1.5, %v862_v36 }
 0x28a   : > { %v864_v40 = vmul.f32 %v1268_v32, %v863_v39 }
 0x28c   : > { %v868_v43 = vsel %vm867_vm4, %v1268_v32, %v864_v40 }
 0x28d   : > { %v870_v44 = vmul.f32 %v869_v42, %v868_v43 }
 0x28f   : > { %v872_v46 = vmul.f32 %v870_v44, %v833_v26  ;;  %v874_v47 = vperm.slane %v870_v44, 0 }
 0x291   : > { %v873_v49 = vsub.f32 %v871_v45, %v872_v46  ;;  %v882_v51 = vmul.f32 %v874_v47, %v812_v6  ;;  %v881_v52 = vmul.f32 %v874_v47, %v811_v58  ;;  %v880_v54 = vmul.f32 %v874_v47, %v1959_v53 }
 0x292   : > { %v879_v55 = vmul.f32 %v874_v47, %v1954_v48  ;;  %v878_v60 = vmul.f32 %v874_v47, %v1946_v41  ;;  %v877_v62 = vmul.f32 %v874_v47, %v1942_v38  ;;  %v876_v58 = vmul.f32 %v874_v47, %v1938_v35  ;;  %v902_v35 = vld [vmem:[#allocation11] sm:$0xf] }
 0x293   : > { %v884_v50 = vperm.slane %v873_v49, 0  ;;  %v875_v53 = vmul.f32 %v874_v47, %v1940_v37 }
 0x295   : > { %v893_v56 = vadd.f32 %v884_v50, %v882_v51  ;;  %v892_v57 = vadd.f32 %v884_v50, %v881_v52  ;;  %v891_v59 = vadd.f32 %v884_v50, %v880_v54  ;;  %v890_v61 = vadd.f32 %v884_v50, %v879_v55 }
 0x296   : > { %v889_v63 = vadd.f32 %v884_v50, %v878_v60  ;;  %v888_v48 = vadd.f32 %v884_v50, %v877_v62  ;;  %v887_v38 = vadd.f32 %v884_v50, %v876_v58  ;;  %v886_v41 = vadd.f32 %v884_v50, %v875_v53 }
 0x297   : > { %901 = vst [vmem:[%s2054_s24 + $0x38] sm:$0xff] %v893_v56  ;;  %914 = vmatpush.msrb.mxu3 %v893_v56 }
 0x298   : > { %900 = vst [vmem:[%s2054_s24 + $0x30] sm:$0xff] %v892_v57 }
 0x299   : > { %915 = vmatpush.msrb.mxu3 %v892_v57  ;;  %899 = vst [vmem:[%s2054_s24 + $0x28] sm:$0xff] %v891_v59 }
 0x29a   : > { %898 = vst [vmem:[%s2054_s24 + $0x20] sm:$0xff] %v890_v61 }
 0x29b   : > { %916 = vmatpush.msrb.mxu3 %v891_v59  ;;  %897 = vst [vmem:[%s2054_s24 + $0x18] sm:$0xff] %v889_v63 }
 0x29c   : > { %896 = vst [vmem:[%s2054_s24 + $0x10] sm:$0xff] %v888_v48 }
 0x29d   : > { %917 = vmatpush.msrb.mxu3 %v890_v61  ;;  %895 = vst [vmem:[%s2054_s24 + $0x8] sm:$0xff] %v887_v38 }
 0x29e   : > { %894 = vst [vmem:[%s2054_s24] sm:$0xff] %v886_v41 }
 0x29f   : > { %918 = vmatpush.msrb.mxu3 %v889_v63 }
 0x2a1   : > { %919 = vmatpush.msrb.mxu3 %v888_v48 }
 0x2a3   : > { %920 = vmatpush.msrb.mxu3 %v887_v38 }
 0x2a5   : > { %921 = vmatpush.msrb.mxu3 %v886_v41 }
 0x2a6   : > { %1143 = vmatmul.msk.f32.vlgmr.msrb.gmra.mxu3 %vm633_vm0, %v902_v35 }
 0x329   : > { %v923_v37 = vpop.f32.mrf.mxu3 }
 0x32a   : > { %926 = vst [vmem:[%s1843_s0] sm:$0xf] %v923_v37 }
 0x32b PF: > { %s2056_s16 = sld [smem:[#allocation17_spill]]  ;;  %s2059_s13 = smov %s1547_s14 }
 0x32c   : > { %s2057_s18 = sld [smem:[#allocation16_spill]] }
 0x32d   : > { %s2058_s15 = sld [smem:[#allocation18_spill]] }
 0x331   : > { %p20_p5 = scmp.ge.s32.totalorder %s2056_s16, 5  }
 0x332   : > { %s2060_s14 = smov %s2057_s18 }
 0x333   :  { %22 = sbr.rel (!%p20_p5) target bundleno = 9 (0x9), region = 166 }
 0x338   :  { %952 = vsyncpa [#allocation3], 1 }
 0x339   :  { %954 = vsyncpa [#allocation3 + $0x1], 1 }
 0x33a   :  { %955 = vsyncpa [#allocation5], 1 }

</bundles_post_ra>
